<compile_context>
chip_gen: v7x
topology: tpu7x:2x2x1
jax: 0.10.0
libtpu: 0.0.40
codegen_flags: <defaults>
</compile_context>

<pallas_src>
import functools

import jax
import jax.numpy as jnp
from jax.experimental import pallas as pl
from jax.experimental.pallas import tpu as pltpu

_LANE = 128
_NEG_BIG = -1e30          # finite "minus infinity" for padded class columns
_TK_SPLIT = 512           # K tile when the feature dim must be split
_K_SINGLE_MAX = 2048      # largest Fpad handled single-shot (x tile fits VMEM at TB<=512)
_TB_CAP = 512             # max batch tile (near HBM roofline, tiny VMEM cost)
_W_RESIDENT_BYTES = 8 << 20   # keep weight VMEM-resident if 2*Fpad*Cpad*2B <= this


def _round_up(x, m):
    return ((x + m - 1) // m) * m


def _softmax_rows_f32(logits):
    # f32 max/exp/sum (v5e has no bf16 VPU/EUP path); exact normalization.
    m = jnp.max(logits, axis=1, keepdims=True)
    e = jnp.exp(logits - m)
    s = jnp.sum(e, axis=1, keepdims=True)
    return e / s


def _single_shot_kernel(x_ref, w_ref, b_ref, o_ref):
    """nk == 1: logits = x @ w + b; softmax; store.  No scratch, no init."""
    logits = jnp.dot(x_ref[...].astype(jnp.bfloat16), w_ref[...],
                     preferred_element_type=jnp.float32) + b_ref[...]
    o_ref[...] = _softmax_rows_f32(logits).astype(o_ref.dtype)


def _ksplit_kernel(x_ref, w_ref, b_ref, o_ref, *, tk, w_resident):
    """nk > 1: accumulate into the resident f32 output block; finalize on last k."""
    k = pl.program_id(1)

    @pl.when(k == 0)
    def _init():
        o_ref[...] = jnp.zeros_like(o_ref)

    if w_resident:
        # Full weight lives in VMEM (constant index map); slice the K chunk here.
        off = pl.multiple_of(k * tk, tk)
        w = w_ref[pl.ds(off, tk), :]
    else:
        w = w_ref[...]

    o_ref[...] += jnp.dot(x_ref[...].astype(jnp.bfloat16), w,
                          preferred_element_type=jnp.float32)

    @pl.when(k == pl.num_programs(1) - 1)
    def _finalize():
        logits = o_ref[...] + b_ref[...]          # padded classes -> -1e30 (stays f32)
        o_ref[...] = _softmax_rows_f32(logits).astype(o_ref.dtype)


def prepare_params(weight, bias):
    """One-time parameter prep, outside the forward path.

    weight: (C, F) PyTorch layout -> (Fpad, Cpad) bf16, zero-padded rows/cols
    bias:   (C,)                  -> (1, Cpad) f32, extra columns = -1e30
    """
    C, F = weight.shape
    Cpad = _round_up(max(C, _LANE), _LANE)
    Fpad = F if F <= _K_SINGLE_MAX else _round_up(F, _TK_SPLIT)
    w_t = jnp.zeros((Fpad, Cpad), jnp.bfloat16).at[:F, :C].set(
        weight.T.astype(jnp.bfloat16))
    b2d = jnp.full((1, Cpad), _NEG_BIG, jnp.float32).at[0, :C].set(
        bias.astype(jnp.float32))
    return w_t, b2d


@functools.partial(jax.jit, static_argnames=("num_classes",))
def torch_linear_forward(x, w_t, b2d, *, num_classes):
    """x: (B, ...) with prod(...) == F; w_t: (Fpad, Cpad) bf16; b2d: (1, Cpad) f32."""
    B = x.shape[0]
    x_flat = x.reshape(B, -1)        # keep original dtype; bf16 cast is fused in-kernel
    F = x_flat.shape[1]
    Fpad, Cpad = w_t.shape
    assert F <= Fpad, "feature dim mismatch"
    if F != Fpad:
        # Padded weight rows are zero, so padded x columns contribute nothing.
        x_flat = jnp.pad(x_flat, ((0, 0), (0, Fpad - F)))

    # Batch tiling: small B -> one block; mid B -> 2 blocks (so the "parallel"
    # axis shards across v7x's two TensorCores); large B -> 512-row blocks.
    if B <= 256:
        TB = B
    elif B <= 2 * _TB_CAP:
        TB = _round_up((B + 1) // 2, 16)
    else:
        TB = _TB_CAP
    nb = pl.cdiv(B, TB)

    x_itemsize = x_flat.dtype.itemsize
    single_shot = Fpad <= _K_SINGLE_MAX

    if single_shot:
        cost = pl.CostEstimate(
            flops=2 * B * Fpad * Cpad,
            transcendentals=B * Cpad,
            bytes_accessed=(B * Fpad * x_itemsize + Fpad * Cpad * 2
                            + 4 * Cpad + 4 * B * Cpad),
        )
        out = pl.pallas_call(
            _single_shot_kernel,
            out_shape=jax.ShapeDtypeStruct((B, Cpad), jnp.float32),
            grid_spec=pltpu.PrefetchScalarGridSpec(
                num_scalar_prefetch=0,
                grid=(nb,),
                in_specs=[
                    pl.BlockSpec((TB, Fpad), lambda i: (i, 0)),    # x tile (streamed)
                    pl.BlockSpec((Fpad, Cpad), lambda i: (0, 0)),  # weight (VMEM-resident)
                    pl.BlockSpec((1, Cpad), lambda i: (0, 0)),     # bias
                ],
                out_specs=pl.BlockSpec((TB, Cpad), lambda i: (i, 0)),
            ),
            compiler_params=pltpu.CompilerParams(
                dimension_semantics=("parallel",)),
            cost_estimate=cost,
        )(x_flat, w_t, b2d)
    else:
        TK = _TK_SPLIT
        nk = Fpad // TK
        w_resident = 2 * Fpad * Cpad * 2 <= _W_RESIDENT_BYTES
        if w_resident:
            w_spec = pl.BlockSpec((Fpad, Cpad), lambda i, k: (0, 0))  # fetched once
            w_bytes = Fpad * Cpad * 2
        else:
            w_spec = pl.BlockSpec((TK, Cpad), lambda i, k: (k, 0))    # streamed per (i,k)
            w_bytes = nb * Fpad * Cpad * 2
        cost = pl.CostEstimate(
            flops=2 * B * Fpad * Cpad,
            transcendentals=B * Cpad,
            bytes_accessed=(B * Fpad * x_itemsize + w_bytes
                            + 4 * Cpad + 4 * B * Cpad),
        )
        out = pl.pallas_call(
            functools.partial(_ksplit_kernel, tk=TK, w_resident=w_resident),
            out_shape=jax.ShapeDtypeStruct((B, Cpad), jnp.float32),
            grid_spec=pltpu.PrefetchScalarGridSpec(
                num_scalar_prefetch=0,
                grid=(nb, nk),
                in_specs=[
                    pl.BlockSpec((TB, TK), lambda i, k: (i, k)),   # x tile
                    w_spec,                                         # weight
                    pl.BlockSpec((1, Cpad), lambda i, k: (0, 0)),  # bias
                ],
                out_specs=pl.BlockSpec((TB, Cpad), lambda i, k: (i, 0)),
            ),
            compiler_params=pltpu.CompilerParams(
                dimension_semantics=("parallel", "arbitrary")),
            cost_estimate=cost,
        )(x_flat, w_t, b2d)

    # Strip class padding (cheap copy over (B, Cpad); C is tiny).
    return out[:, :num_classes]


if __name__ == "__main__":
    # Module config: TorchLinear(image_size=16, num_classes=10)
    image_size = 16
    num_classes = 10
    batch = 8
    F = image_size ** 2

    key = jax.random.PRNGKey(0)
    kx, kw, kb = jax.random.split(key, 3)

    # PyTorch Linear default init: U(-1/sqrt(F), 1/sqrt(F))
    bound = 1.0 / jnp.sqrt(jnp.float32(F))
    weight = jax.random.uniform(kw, (num_classes, F), jnp.float32, -bound, bound)
    bias = jax.random.uniform(kb, (num_classes,), jnp.float32, -bound, bound)

    # Example input: (B, H, W) grayscale images (flattened inside forward)
    x = jax.random.normal(kx, (batch, image_size, image_size), jnp.float32)

    w_t, b2d = prepare_params(weight, bias)            # one-time, outside forward
    out = torch_linear_forward(x, w_t, b2d, num_classes=num_classes)
    out = jax.block_until_ready(out)

    # Reference with the same bf16 operand rounding (MXU accumulates in f32).
    xb = x.reshape(batch, -1).astype(jnp.bfloat16).astype(jnp.float32)
    wb = weight.astype(jnp.bfloat16).astype(jnp.float32)
    ref = jax.nn.softmax(xb @ wb.T + bias, axis=1)

    assert out.shape == (batch, num_classes)
    assert jnp.allclose(out, ref, atol=2e-3, rtol=2e-3), float(
        jnp.max(jnp.abs(out - ref)))

    print("KERNEL_OK")
</pallas_src>

<mosaic_0001>
module attributes {stable_mosaic.version = 11 : i64} {
  func.func @_single_shot_kernel(%arg0: i32, %arg1: memref<8x256xf32, #tpu.memory_space<vmem>>, %arg2: memref<256x128xbf16, #tpu.memory_space<vmem>>, %arg3: memref<1x128xf32, #tpu.memory_space<vmem>>, %arg4: memref<8x128xf32, #tpu.memory_space<vmem>>) attributes {dimension_semantics = [#tpu.dimension_semantics<parallel>], iteration_bounds = array<i64: 1>, scalar_prefetch = 0 : i64, scratch_operands = 0 : i64, tpu.core_type = #tpu.core_type<tc>, window_params = [{transform_indices = @transform_0, window_bounds = array<i64: 8, 256>}, {pipeline_mode = #tpu.pipeline_mode<synchronous>, transform_indices = @transform_1, window_bounds = array<i64: 256, 128>}, {pipeline_mode = #tpu.pipeline_mode<synchronous>, transform_indices = @transform_2, window_bounds = array<i64: 1, 128>}, {transform_indices = @transform_3, window_bounds = array<i64: 8, 128>}]} {
    %c0 = arith.constant 0 : index
    %c0_0 = arith.constant 0 : index
    %0 = vector.load %arg1[%c0, %c0_0] : memref<8x256xf32, #tpu.memory_space<vmem>>, vector<8x256xf32>
    %1 = arith.truncf %0 : vector<8x256xf32> to vector<8x256xbf16>
    %c0_1 = arith.constant 0 : index
    %c0_2 = arith.constant 0 : index
    %2 = vector.load %arg2[%c0_1, %c0_2] : memref<256x128xbf16, #tpu.memory_space<vmem>>, vector<256x128xbf16>
    %cst = arith.constant dense<0.000000e+00> : vector<8x128xf32>
    %3 = tpu.matmul %1, %2, %cst {dimension_numbers = #tpu.dot_dimension_numbers<[1], [0], [0], [1], [0, 0, 1, 1], [], []>} : vector<8x256xbf16>, vector<256x128xbf16>, vector<8x128xf32> -> vector<8x128xf32>
    %c0_3 = arith.constant 0 : index
    %c0_4 = arith.constant 0 : index
    %4 = vector.load %arg3[%c0_3, %c0_4] : memref<1x128xf32, #tpu.memory_space<vmem>>, vector<1x128xf32>
    %5 = vector.broadcast %4 : vector<1x128xf32> to vector<8x128xf32>
    %6 = arith.addf %3, %5 : vector<8x128xf32>
    %cst_5 = arith.constant dense<0xFF800000> : vector<8xf32>
    %7 = vector.multi_reduction <maximumf>, %6, %cst_5 [1] : vector<8x128xf32> to vector<8xf32>
    %8 = vector.shape_cast %7 : vector<8xf32> to vector<8x1xf32>
    %9 = vector.broadcast %8 : vector<8x1xf32> to vector<8x128xf32>
    %10 = arith.subf %6, %9 : vector<8x128xf32>
    %11 = math.exp %10 : vector<8x128xf32>
    %cst_6 = arith.constant dense<0.000000e+00> : vector<8xf32>
    %12 = vector.multi_reduction <add>, %11, %cst_6 [1] : vector<8x128xf32> to vector<8xf32>
    %13 = vector.shape_cast %12 : vector<8xf32> to vector<8x1xf32>
    %14 = vector.broadcast %13 : vector<8x1xf32> to vector<8x128xf32>
    %15 = arith.divf %11, %14 : vector<8x128xf32>
    %c0_7 = arith.constant 0 : index
    %c0_8 = arith.constant 0 : index
    %16 = vector.load %arg4[%c0_7, %c0_8] : memref<8x128xf32, #tpu.memory_space<vmem>>, vector<8x128xf32>
    tpu.vector_store %arg4[%c0_7, %c0_8], %15 {strides = array<i32>} : memref<8x128xf32, #tpu.memory_space<vmem>>, vector<8x128xf32>,
    return
  }
  func.func @transform_0(%arg0: i32) -> (i32, i32) {
    %c0_i32 = arith.constant 0 : i32
    %c0_i32_0 = arith.constant 0 : i32
    return %arg0, %c0_i32 : i32, i32
  }
  func.func @transform_1(%arg0: i32) -> (i32, i32) {
    %c0_i32 = arith.constant 0 : i32
    %c0_i32_0 = arith.constant 0 : i32
    %c0_i32_1 = arith.constant 0 : i32
    return %c0_i32, %c0_i32_0 : i32, i32
  }
  func.func @transform_2(%arg0: i32) -> (i32, i32) {
    %c0_i32 = arith.constant 0 : i32
    %c0_i32_0 = arith.constant 0 : i32
    %c0_i32_1 = arith.constant 0 : i32
    return %c0_i32, %c0_i32_0 : i32, i32
  }
  func.func @transform_3(%arg0: i32) -> (i32, i32) {
    %c0_i32 = arith.constant 0 : i32
    %c0_i32_0 = arith.constant 0 : i32
    return %arg0, %c0_i32 : i32, i32
  }
}

</mosaic_0001>

<bundles_post_ra>
// kernel: torch_linear_forward.1
= control target key start
LH: loop header
LB: loop body
LE: loop exit
PB: predicated region body
PF: predicated region fallthrough
CT: control target
= control target key end

     0   :  { %s393_s0 = inlined_call_operand.vmem [shape: f32[8,256], index: 0, kind: input, shape index: {}]   ;;  %s394_s1 = inlined_call_operand.vmem [shape: bf16[256,128], index: 1, kind: input, shape index: {}]   ;;  %s395_s2 = inlined_call_operand.vmem [shape: f32[1,128], index: 2, kind: input, shape index: {}]   ;;  %s396_s3 = inlined_call_operand.hbm [shape: f32[8,128], index: 3, kind: output, shape index: {}]  }
   0x1   :  { %v259_v0 = vld [vmem:[%s394_s1 + $0x40] sm:$0xff]   ;;  %v261_v2 = vld [vmem:[%s394_s1 + $0x48] sm:$0xff]   ;;  %v263_v4 = vld [vmem:[%s394_s1 + $0x50] sm:$0xff]  }
   0x2   :  { %v260_v1 = vld [vmem:[%s394_s1] sm:$0xff]   ;;  %236 = vmatprep.subr.bf16.mxu0 %v259_v0  ;;  %v262_v3 = vld [vmem:[%s394_s1 + $0x8] sm:$0xff]   ;;  %v264_v5 = vld [vmem:[%s394_s1 + $0x10] sm:$0xff]  }
   0x3   :  { %237 = vmatpush3.bf16.msra.mxu0 %v260_v1  ;;  %v265_v6 = vld [vmem:[%s394_s1 + $0x58] sm:$0xff]   ;;  %v267_v8 = vld [vmem:[%s394_s1 + $0x60] sm:$0xff]   ;;  %v269_v10 = vld [vmem:[%s394_s1 + $0x68] sm:$0xff]  }
   0x4   :  { %238 = vmatprep.subr.bf16.mxu0 %v261_v2  ;;  %v266_v7 = vld [vmem:[%s394_s1 + $0x18] sm:$0xff]   ;;  %v268_v9 = vld [vmem:[%s394_s1 + $0x20] sm:$0xff]   ;;  %v17_v11 = vld [vmem:[%s393_s0 + $0x8] sm:$0xff] }
   0x7   :  { %239 = vmatpush3.bf16.msra.mxu0 %v262_v3 }
   0x8   :  { %240 = vmatprep.subr.bf16.mxu0 %v263_v4 }
   0xb   :  { %241 = vmatpush3.bf16.msra.mxu0 %v264_v5 }
   0xc   :  { %242 = vmatprep.subr.bf16.mxu0 %v265_v6 }
   0xf   :  { %243 = vmatpush3.bf16.msra.mxu0 %v266_v7 }
  0x10   :  { %244 = vmatprep.subr.bf16.mxu0 %v267_v8 }
  0x11   :  { %8 = vsyncpa [#allocation3], 0  ;;  %v19_v12 = vpack.c.bf16 %v17_v11, %v17_v11  ;;  %v270_v13 = vld [vmem:[%s394_s1 + $0x28] sm:$0xff]   ;;  %v271_v14 = vld [vmem:[%s394_s1 + $0x70] sm:$0xff]  }
  0x12   :  { %v272_v15 = vld [vmem:[%s394_s1 + $0x30] sm:$0xff]   ;;  %v273_v16 = vld [vmem:[%s394_s1 + $0x78] sm:$0xff]   ;;  %v16_v18 = vld [vmem:[%s393_s0] sm:$0xff]  ;;  %s303_s0 = smov [#allocation2]  }
  0x13   :  { %245 = vmatpush3.bf16.msra.mxu0 %v268_v9  ;;  %187 = vmatprep.mubr.bf16.mxu0 %v19_v12  ;;  %v274_v17 = vld [vmem:[%s394_s1 + $0x38] sm:$0xff]   ;;  %v18_v19 = vpack.c.bf16 %v16_v18, %v16_v18  ;;  %v219_v22 = vld [vmem:[%s395_s2] ss:$0 sm:$0xff]  ;;  %s211_s1 = sshll.u32 %s303_s0, 4  ;;  %s212_s1 = int_to_ptr.vmem [resolvable:$true] %s211_s1 }
  0x14   :  { %246 = vmatprep.subr.bf16.mxu0 %v269_v10  ;;  %s279_s2 = scalar_lea.vmem %s212_s1, 128  ;;  %p284_p1 = scmp.lt.s32.totalorder %s212_s1, %s212_s1 }
  0x15   :  { %p280_p0 = scmp.ne.s32.totalorder %s212_s1, %s279_s2  ;;  %p285_p2 = scmp.lt.s32.totalorder %s279_s2, %s279_s2 }
  0x17   :  { %247 = vmatpush3.bf16.msra.mxu0 %v270_v13  ;;  %p286_p3 = por %p285_p2, %p284_p1 }
  0x18   :  { %248 = vmatprep.subr.bf16.mxu0 %v271_v14 }
  0x19   :  { %p287_p4 = pnand %p286_p3, %p280_p0 }
  0x1b   :  { %249 = vmatpush3.bf16.msra.mxu0 %v272_v15 }
  0x1c   :  { %250 = vmatprep.subr.bf16.mxu0 %v273_v16 }
  0x1f   :  { %251 = vmatpush3.bf16.msra.mxu0 %v274_v17 }
  0x22   :  { %188 = vmatmul.mubr.bf16.vlgmr.msra.gmra.mrb[0].mxu0 %v18_v19 }
  0xf5   :  { %v252_v20 = vpop.f32.mrb[0].mxu0 }
  0xf6   :  { %v253_v21 = vpop.f32.mrb[1].mxu0 }
  0xf7   :  { %v254_v23 = vadd.f32 %v253_v21, %v252_v20  ;;  %v255_v24 = vpop.f32.mrb[2].mxu0 }
  0xf8   :  { %v256_v25 = vpop.f32.mrb[3].mxu0 }
  0xf9   :  { %v190_v26 = vadd.f32 %v254_v23, %v219_v22 }
  0xfb   :  { %195 = vmax.xlane.f32.xlu0 %v190_v26 }
 0x188   :  { %v196_v27 = vpop.xlane.xlu0 %195 }
 0x189   :  { %v197_v28 = vsub.f32 %v190_v26, %v196_v27 }
 0x18b   :  { %v198_v29 = vmul.f32 1.442695, %v197_v28 }
 0x18d   :  { %275 = vpow2.f32 %v198_v29 }
 0x197   :  { %v276_v30 = vpop.eup %275 }
 0x198   :  { %200 = vadd.xlane.f32.xlu0 %v276_v30 }
 0x225   :  { %v201_v31 = vpop.xlane.xlu0 %200 }
 0x226   :  { %277 = vrcp.f32 %v201_v31 }
 0x230   :  { %v278_v32 = vpop.eup %277 }
 0x231   :  { %v203_v33 = vmul.f32 %v278_v32, %v276_v30 }
 0x233   :  { %204 = vst [vmem:[#allocation2] sm:$0xff] %v203_v33 }
 0x234   :  { %290 = shalt.err (!%p287_p4)
}
 0x235   :  { %s291_s25 = scalar_lea.hbm %s396_s3, 128 }
 0x236   :  { %p292_p5 = scmp.ne.s32.totalorder %s396_s3, %s291_s25  ;;  %p295_p6 = scmp.lt.u32.totalorder %s291_s25, %s396_s3 }
 0x238   :  { %p297_p7 = pnand %p295_p6, %p292_p5 }
 0x23a   :  { %300 = shalt.err (!%p297_p7)
}
 0x23b   :  { %214 = dma.vmem_to_hbm [thread:$0]  %s212_s1, 128, %s396_s3, [#allocation3]  }
 0x23c   :  { %301 = dma.done.wait [#allocation3], 128  }
 0x23d   :  { %302 = vsyncadd [#allocation3], 4294967168 }
 0x23e   :  { %218 = vsyncpa [#allocation3], 1 }

</bundles_post_ra>
